<compile_context>
chip_gen: v7x
topology: tpu7x:2x2x1
jax: 0.10.0
libtpu: 0.0.40
codegen_flags: <defaults>
</compile_context>

<pallas_src>
import functools

import jax
import jax.numpy as jnp
from jax.experimental import pallas as pl
from jax.experimental.pallas import tpu as pltpu

_LANE = 128
_SUBLANE = 8
_NEG_BIG = -1e30  # finite "-inf" for padded class lanes (must stay f32)


def _round_up(x, m):
    return (x + m - 1) // m * m


def _make_kernel(num_padded_classes):
    def kernel(x_ref, w1_ref, b1_ref, w2_ref, b2_ref, tgt_ref,
               loss_part_ref, acc_part_ref):
        # predictor: Linear + ReLU  (bf16 operands, f32 MXU accumulation)
        h = jnp.dot(x_ref[...], w1_ref[...], preferred_element_type=jnp.float32)
        h = jnp.maximum(h + b1_ref[...], 0.0)                              # [TB, Hp] f32

        # tail: Linear -> logits [TB, Cp]; padded class lanes get -1e30 via the bias
        logits = jnp.dot(h.astype(w2_ref.dtype), w2_ref[...],
                         preferred_element_type=jnp.float32) + b2_ref[...]

        tgt = tgt_ref[...]                                   # [TB, 1] int32, -1 == pad row
        valid = (tgt >= 0).astype(jnp.float32)               # [TB, 1]
        ids = jax.lax.broadcasted_iota(jnp.int32, logits.shape, 1)

        # cross entropy: numerically-stable log-sum-exp; target logit via iota mask
        m = jnp.max(logits, axis=-1, keepdims=True)                        # [TB, 1]
        lse = m + jnp.log(jnp.sum(jnp.exp(logits - m), axis=-1, keepdims=True))
        tgt_logit = jnp.sum(jnp.where(ids == tgt, logits, 0.0),
                            axis=-1, keepdims=True)
        losses = (lse - tgt_logit) * valid                                 # [TB, 1]

        # accuracy: argmax with min-index tie-break (matches torch/jnp argmax)
        pred = jnp.min(jnp.where(logits == m, ids, num_padded_classes),
                       axis=-1, keepdims=True)                             # [TB, 1]
        correct = (pred == tgt).astype(jnp.float32) * valid                # [TB, 1]

        # per-tile (unscaled) partial sums -> lane-dense VMEM output blocks.
        # No cross-step dependency, so the batch grid axis can run "parallel".
        loss_part_ref[...] = jnp.broadcast_to(jnp.sum(losses), loss_part_ref.shape)
        acc_part_ref[...] = jnp.broadcast_to(jnp.sum(correct), acc_part_ref.shape)

    return kernel


@functools.partial(jax.jit, static_argnames=("tile_b",))
def model_forward(feature, target, w1, b1, w2, b2, *, tile_b=256):
    """Returns (loss, accuracy) as f32 scalars.

    tile_b: batch-tile rows per grid step (use ~128 on v5e, 256 on v6e/v7x);
    small batches collapse to a single grid step automatically.
    """
    B, D = feature.shape
    H = w1.shape[1]
    C = w2.shape[1]

    # feature dim: only sublane-align (no 128-lane pad -> 4x less streamed HBM);
    # hidden/class dims stay lane-dense; batch padded to the tile.
    Dp = _round_up(D, _SUBLANE)
    Hp = _round_up(H, _LANE)
    Cp = _round_up(C, _LANE)
    tb = _round_up(min(tile_b, _round_up(B, _SUBLANE)), _SUBLANE)
    Bp = _round_up(B, tb)
    G = Bp // tb

    def pad2(a, rows, cols, value=0.0):
        pr, pc = rows - a.shape[0], cols - a.shape[1]
        if pr == 0 and pc == 0:
            return a
        return jnp.pad(a, ((0, pr), (0, pc)), constant_values=value)

    x_p = pad2(feature, Bp, Dp).astype(jnp.bfloat16)
    w1_p = pad2(w1, Dp, Hp).astype(jnp.bfloat16)
    w2_p = pad2(w2, Hp, Cp).astype(jnp.bfloat16)
    b1_p = jnp.pad(b1, (0, Hp - H)).reshape(1, Hp).astype(jnp.float32)
    b2_p = jnp.pad(b2, (0, Cp - C),
                   constant_values=_NEG_BIG).reshape(1, Cp).astype(jnp.float32)
    tgt_p = jnp.pad(target.astype(jnp.int32), (0, Bp - B),
                    constant_values=-1).reshape(Bp, 1)

    kernel = _make_kernel(num_padded_classes=Cp)

    loss_parts, acc_parts = pl.pallas_call(
        kernel,
        out_shape=(jax.ShapeDtypeStruct((G, _SUBLANE, _LANE), jnp.float32),
                   jax.ShapeDtypeStruct((G, _SUBLANE, _LANE), jnp.float32)),
        grid=(G,),
        in_specs=[
            pl.BlockSpec((tb, Dp), lambda i: (i, 0)),    # x tile, pipelined over batch
            pl.BlockSpec((Dp, Hp), lambda i: (0, 0)),    # w1 resident
            pl.BlockSpec((1, Hp), lambda i: (0, 0)),     # b1 resident
            pl.BlockSpec((Hp, Cp), lambda i: (0, 0)),    # w2 resident
            pl.BlockSpec((1, Cp), lambda i: (0, 0)),     # b2 resident (f32, -1e30 pads)
            pl.BlockSpec((tb, 1), lambda i: (i, 0)),     # targets tile
        ],
        out_specs=(
            pl.BlockSpec((1, _SUBLANE, _LANE), lambda i: (i, 0, 0)),  # per-tile loss sum
            pl.BlockSpec((1, _SUBLANE, _LANE), lambda i: (i, 0, 0)),  # per-tile correct sum
        ),
        compiler_params=pltpu.CompilerParams(
            dimension_semantics=("parallel",)),   # disjoint output blocks -> megacore safe
    )(x_p, w1_p, b1_p, w2_p, b2_p, tgt_p)

    inv_b = jnp.float32(1.0 / B)                  # applied once, outside the kernel
    loss = jnp.sum(loss_parts[:, 0, 0]) * inv_b
    acc = jnp.sum(acc_parts[:, 0, 0]) * inv_b
    return loss, acc


if __name__ == "__main__":
    B, D, H, C = 64, 32, 32, 16

    key = jax.random.PRNGKey(0)
    k_x, k_t, k_w1, k_b1, k_w2, k_b2 = jax.random.split(key, 6)

    feature = jax.random.normal(k_x, (B, D), dtype=jnp.float32)
    target = jax.random.randint(k_t, (B,), 0, C, dtype=jnp.int32)

    # deterministic parameter init (synthetic; no checkpoint load)
    w1 = jax.random.normal(k_w1, (D, H), dtype=jnp.float32) * (1.0 / D ** 0.5)
    b1 = jax.random.normal(k_b1, (H,), dtype=jnp.float32) * 0.01
    w2 = jax.random.normal(k_w2, (H, C), dtype=jnp.float32) * (1.0 / H ** 0.5)
    b2 = jax.random.normal(k_b2, (C,), dtype=jnp.float32) * 0.01

    loss, acc = model_forward(feature, target, w1, b1, w2, b2)
    jax.block_until_ready((loss, acc))

    # reference that replicates the kernel's bf16-matmul numerics (tight check)
    xb, w1b, w2b = (a.astype(jnp.bfloat16) for a in (feature, w1, w2))
    h_ref = jnp.maximum(
        jnp.dot(xb, w1b, preferred_element_type=jnp.float32) + b1, 0.0)
    logits_ref = jnp.dot(h_ref.astype(jnp.bfloat16), w2b,
                         preferred_element_type=jnp.float32) + b2
    lse_ref = jax.scipy.special.logsumexp(logits_ref, axis=-1)
    loss_ref = jnp.mean(lse_ref - logits_ref[jnp.arange(B), target])
    acc_ref = jnp.mean((jnp.argmax(logits_ref, axis=-1) == target).astype(jnp.float32))
    assert jnp.allclose(loss, loss_ref, atol=1e-3), (loss, loss_ref)
    assert jnp.allclose(acc, acc_ref, atol=1e-6), (acc, acc_ref)

    # sanity check against full-f32 module semantics (loose, bf16 matmuls)
    h32 = jnp.maximum(feature @ w1 + b1, 0.0)
    logits32 = h32 @ w2 + b2
    loss32 = jnp.mean(jax.scipy.special.logsumexp(logits32, axis=-1)
                      - logits32[jnp.arange(B), target])
    assert jnp.allclose(loss, loss32, atol=5e-2), (loss, loss32)

    print("KERNEL_OK")
</pallas_src>

<mosaic_0001>
module attributes {stable_mosaic.version = 11 : i64} {
  func.func @kernel(%arg0: i32, %arg1: memref<64x32xbf16, #tpu.memory_space<vmem>>, %arg2: memref<32x128xbf16, #tpu.memory_space<vmem>>, %arg3: memref<1x128xf32, #tpu.memory_space<vmem>>, %arg4: memref<128x128xbf16, #tpu.memory_space<vmem>>, %arg5: memref<1x128xf32, #tpu.memory_space<vmem>>, %arg6: memref<64x1xi32, #tpu.memory_space<vmem>>, %arg7: memref<1x8x128xf32, #tpu.memory_space<vmem>>, %arg8: memref<1x8x128xf32, #tpu.memory_space<vmem>>) attributes {dimension_semantics = [#tpu.dimension_semantics<parallel>], iteration_bounds = array<i64: 1>, scalar_prefetch = 0 : i64, scratch_operands = 0 : i64, tpu.core_type = #tpu.core_type<tc>, window_params = [{transform_indices = @transform_0, window_bounds = array<i64: 64, 32>}, {pipeline_mode = #tpu.pipeline_mode<synchronous>, transform_indices = @transform_1, window_bounds = array<i64: 32, 128>}, {pipeline_mode = #tpu.pipeline_mode<synchronous>, transform_indices = @transform_2, window_bounds = array<i64: 1, 128>}, {pipeline_mode = #tpu.pipeline_mode<synchronous>, transform_indices = @transform_3, window_bounds = array<i64: 128, 128>}, {pipeline_mode = #tpu.pipeline_mode<synchronous>, transform_indices = @transform_4, window_bounds = array<i64: 1, 128>}, {transform_indices = @transform_5, window_bounds = array<i64: 64, 1>}, {transform_indices = @transform_6, window_bounds = array<i64: 1, 8, 128>}, {transform_indices = @transform_7, window_bounds = array<i64: 1, 8, 128>}]} {
    %c0 = arith.constant 0 : index
    %c0_0 = arith.constant 0 : index
    %0 = vector.load %arg1[%c0, %c0_0] : memref<64x32xbf16, #tpu.memory_space<vmem>>, vector<64x32xbf16>
    %c0_1 = arith.constant 0 : index
    %c0_2 = arith.constant 0 : index
    %1 = vector.load %arg2[%c0_1, %c0_2] : memref<32x128xbf16, #tpu.memory_space<vmem>>, vector<32x128xbf16>
    %cst = arith.constant dense<0.000000e+00> : vector<64x128xf32>
    %2 = tpu.matmul %0, %1, %cst {dimension_numbers = #tpu.dot_dimension_numbers<[1], [0], [0], [1], [0, 0, 1, 1], [], []>} : vector<64x32xbf16>, vector<32x128xbf16>, vector<64x128xf32> -> vector<64x128xf32>
    %c0_3 = arith.constant 0 : index
    %c0_4 = arith.constant 0 : index
    %3 = vector.load %arg3[%c0_3, %c0_4] : memref<1x128xf32, #tpu.memory_space<vmem>>, vector<1x128xf32>
    %4 = vector.broadcast %3 : vector<1x128xf32> to vector<64x128xf32>
    %5 = arith.addf %2, %4 : vector<64x128xf32>
    %cst_5 = arith.constant 0.000000e+00 : f32
    %6 = vector.broadcast %cst_5 : f32 to vector<64x128xf32>
    %7 = arith.maximumf %5, %6 : vector<64x128xf32>
    %8 = arith.truncf %7 : vector<64x128xf32> to vector<64x128xbf16>
    %c0_6 = arith.constant 0 : index
    %c0_7 = arith.constant 0 : index
    %9 = vector.load %arg4[%c0_6, %c0_7] : memref<128x128xbf16, #tpu.memory_space<vmem>>, vector<128x128xbf16>
    %cst_8 = arith.constant dense<0.000000e+00> : vector<64x128xf32>
    %10 = tpu.matmul %8, %9, %cst_8 {dimension_numbers = #tpu.dot_dimension_numbers<[1], [0], [0], [1], [0, 0, 1, 1], [], []>} : vector<64x128xbf16>, vector<128x128xbf16>, vector<64x128xf32> -> vector<64x128xf32>
    %c0_9 = arith.constant 0 : index
    %c0_10 = arith.constant 0 : index
    %11 = vector.load %arg5[%c0_9, %c0_10] : memref<1x128xf32, #tpu.memory_space<vmem>>, vector<1x128xf32>
    %12 = vector.broadcast %11 : vector<1x128xf32> to vector<64x128xf32>
    %13 = arith.addf %10, %12 : vector<64x128xf32>
    %c0_11 = arith.constant 0 : index
    %c0_12 = arith.constant 0 : index
    %14 = vector.load %arg6[%c0_11, %c0_12] : memref<64x1xi32, #tpu.memory_space<vmem>>, vector<64x1xi32>
    %c0_i32 = arith.constant 0 : i32
    %15 = vector.broadcast %c0_i32 : i32 to vector<64x1xi32>
    %16 = arith.cmpi sge, %14, %15 : vector<64x1xi32>
    %17 = arith.extui %16 : vector<64x1xi1> to vector<64x1xi32>
    %18 = arith.sitofp %17 : vector<64x1xi32> to vector<64x1xf32>
    %19 = tpu.iota {dimensions = array<i32: 1>} : vector<64x128xi32>
    %cst_13 = arith.constant dense<0xFF800000> : vector<64xf32>
    %20 = vector.multi_reduction <maximumf>, %13, %cst_13 [1] : vector<64x128xf32> to vector<64xf32>
    %21 = vector.shape_cast %20 : vector<64xf32> to vector<64x1xf32>
    %22 = vector.broadcast %21 : vector<64x1xf32> to vector<64x128xf32>
    %23 = arith.subf %13, %22 : vector<64x128xf32>
    %24 = math.exp %23 : vector<64x128xf32>
    %cst_14 = arith.constant dense<0.000000e+00> : vector<64xf32>
    %25 = vector.multi_reduction <add>, %24, %cst_14 [1] : vector<64x128xf32> to vector<64xf32>
    %26 = vector.shape_cast %25 : vector<64xf32> to vector<64x1xf32>
    %27 = math.log %26 : vector<64x1xf32>
    %28 = arith.addf %21, %27 : vector<64x1xf32>
    %29 = vector.broadcast %14 : vector<64x1xi32> to vector<64x128xi32>
    %30 = arith.cmpi eq, %19, %29 : vector<64x128xi32>
    %cst_15 = arith.constant 0.000000e+00 : f32
    %31 = vector.broadcast %cst_15 : f32 to vector<64x128xf32>
    %32 = arith.select %30, %13, %31 : vector<64x128xi1>, vector<64x128xf32>
    %cst_16 = arith.constant dense<0.000000e+00> : vector<64xf32>
    %33 = vector.multi_reduction <add>, %32, %cst_16 [1] : vector<64x128xf32> to vector<64xf32>
    %34 = vector.shape_cast %33 : vector<64xf32> to vector<64x1xf32>
    %35 = arith.subf %28, %34 : vector<64x1xf32>
    %36 = arith.mulf %35, %18 : vector<64x1xf32>
    %37 = vector.broadcast %21 : vector<64x1xf32> to vector<64x128xf32>
    %38 = arith.cmpf oeq, %13, %37 : vector<64x128xf32>
    %c128_i32 = arith.constant 128 : i32
    %39 = vector.broadcast %c128_i32 : i32 to vector<64x128xi32>
    %40 = arith.select %38, %19, %39 : vector<64x128xi1>, vector<64x128xi32>
    %cst_17 = arith.constant dense<2147483647> : vector<64xi32>
    %41 = vector.multi_reduction <minsi>, %40, %cst_17 [1] : vector<64x128xi32> to vector<64xi32>
    %42 = vector.shape_cast %41 : vector<64xi32> to vector<64x1xi32>
    %43 = arith.cmpi eq, %42, %14 : vector<64x1xi32>
    %44 = arith.extui %43 : vector<64x1xi1> to vector<64x1xi32>
    %45 = arith.sitofp %44 : vector<64x1xi32> to vector<64x1xf32>
    %46 = arith.mulf %45, %18 : vector<64x1xf32>
    %47 = vector.shape_cast %36 : vector<64x1xf32> to vector<1x64x1xf32>
    %cst_18 = arith.constant dense<0.000000e+00> : vector<1xf32>
    %48 = vector.multi_reduction <add>, %47, %cst_18 [1, 2] : vector<1x64x1xf32> to vector<1xf32>
    %49 = vector.shape_cast %48 : vector<1xf32> to vector<1x1x1xf32>
    %50 = vector.extract %49[0, 0, 0] : f32 from vector<1x1x1xf32>
    %51 = vector.broadcast %50 : f32 to vector<1x8x128xf32>
    %c0_19 = arith.constant 0 : index
    %c0_20 = arith.constant 0 : index
    %c0_21 = arith.constant 0 : index
    %52 = vector.load %arg7[%c0_19, %c0_20, %c0_21] : memref<1x8x128xf32, #tpu.memory_space<vmem>>, vector<1x8x128xf32>
    tpu.vector_store %arg7[%c0_19, %c0_20, %c0_21], %51 {strides = array<i32>} : memref<1x8x128xf32, #tpu.memory_space<vmem>>, vector<1x8x128xf32>,
    %53 = vector.shape_cast %46 : vector<64x1xf32> to vector<1x64x1xf32>
    %cst_22 = arith.constant dense<0.000000e+00> : vector<1xf32>
    %54 = vector.multi_reduction <add>, %53, %cst_22 [1, 2] : vector<1x64x1xf32> to vector<1xf32>
    %55 = vector.shape_cast %54 : vector<1xf32> to vector<1x1x1xf32>
    %56 = vector.extract %55[0, 0, 0] : f32 from vector<1x1x1xf32>
    %57 = vector.broadcast %56 : f32 to vector<1x8x128xf32>
    %c0_23 = arith.constant 0 : index
    %c0_24 = arith.constant 0 : index
    %c0_25 = arith.constant 0 : index
    %58 = vector.load %arg8[%c0_23, %c0_24, %c0_25] : memref<1x8x128xf32, #tpu.memory_space<vmem>>, vector<1x8x128xf32>
    tpu.vector_store %arg8[%c0_23, %c0_24, %c0_25], %57 {strides = array<i32>} : memref<1x8x128xf32, #tpu.memory_space<vmem>>, vector<1x8x128xf32>,
    return
  }
  func.func @transform_0(%arg0: i32) -> (i32, i32) {
    %c0_i32 = arith.constant 0 : i32
    %c0_i32_0 = arith.constant 0 : i32
    return %arg0, %c0_i32 : i32, i32
  }
  func.func @transform_1(%arg0: i32) -> (i32, i32) {
    %c0_i32 = arith.constant 0 : i32
    %c0_i32_0 = arith.constant 0 : i32
    %c0_i32_1 = arith.constant 0 : i32
    return %c0_i32, %c0_i32_0 : i32, i32
  }
  func.func @transform_2(%arg0: i32) -> (i32, i32) {
    %c0_i32 = arith.constant 0 : i32
    %c0_i32_0 = arith.constant 0 : i32
    %c0_i32_1 = arith.constant 0 : i32
    return %c0_i32, %c0_i32_0 : i32, i32
  }
  func.func @transform_3(%arg0: i32) -> (i32, i32) {
    %c0_i32 = arith.constant 0 : i32
    %c0_i32_0 = arith.constant 0 : i32
    %c0_i32_1 = arith.constant 0 : i32
    return %c0_i32, %c0_i32_0 : i32, i32
  }
  func.func @transform_4(%arg0: i32) -> (i32, i32) {
    %c0_i32 = arith.constant 0 : i32
    %c0_i32_0 = arith.constant 0 : i32
    %c0_i32_1 = arith.constant 0 : i32
    return %c0_i32, %c0_i32_0 : i32, i32
  }
  func.func @transform_5(%arg0: i32) -> (i32, i32) {
    %c0_i32 = arith.constant 0 : i32
    %c0_i32_0 = arith.constant 0 : i32
    return %arg0, %c0_i32 : i32, i32
  }
  func.func @transform_6(%arg0: i32) -> (i32, i32, i32) {
    %c0_i32 = arith.constant 0 : i32
    %c0_i32_0 = arith.constant 0 : i32
    %c0_i32_1 = arith.constant 0 : i32
    return %arg0, %c0_i32, %c0_i32_0 : i32, i32, i32
  }
  func.func @transform_7(%arg0: i32) -> (i32, i32, i32) {
    %c0_i32 = arith.constant 0 : i32
    %c0_i32_0 = arith.constant 0 : i32
    %c0_i32_1 = arith.constant 0 : i32
    return %arg0, %c0_i32, %c0_i32_0 : i32, i32, i32
  }
}

</mosaic_0001>

<bundles_post_ra>
// kernel: model_forward.1
= control target key start
LH: loop header
LB: loop body
LE: loop exit
PB: predicated region body
PF: predicated region fallthrough
CT: control target
= control target key end

     0   :  { %vm77_vm0 = vcmask 261120   ;;  %v854_v43 = vmov 0   ;;  %s1290_s1 = inlined_call_operand.vmem [shape: bf16[32,128], index: 1, kind: input, shape index: {}]   ;;  %s1291_s0 = inlined_call_operand.vmem [shape: bf16[64,32], index: 0, kind: input, shape index: {}]   ;;  %s1292_s3 = inlined_call_operand.vmem [shape: bf16[128,128], index: 3, kind: input, shape index: {}]   ;;  %s1293_s2 = inlined_call_operand.vmem [shape: f32[1,128], index: 2, kind: input, shape index: {}]   ;;  %s1294_s4 = inlined_call_operand.vmem [shape: f32[1,128], index: 4, kind: input, shape index: {}]   ;;  %s1295_s5 = inlined_call_operand.vmem [shape: s32[64,1], index: 5, kind: input, shape index: {}]   ;;  %s1296_s6 = inlined_call_operand.vmem [shape: f32[1,8,128], index: 6, kind: output, shape index: {0}]   ;;  %s1297_s7 = inlined_call_operand.vmem [shape: f32[1,8,128], index: 7, kind: output, shape index: {1}]  }
   0x1   :  { %v808_v0 = vld [vmem:[%s1290_s1] sm:$0xff]   ;;  %v809_v1 = vld [vmem:[%s1290_s1 + $0x8] sm:$0xff]   ;;  %v812_v4 = vld [vmem:[%s1291_s0 + $0x10] sm:$0xff]   ;;  %806 = vset.pattern.permute.xlu1 %v854_v43  ;;  %807 = vset.pattern.permute.xlu0 %v854_v43 }
   0x2   :  { %764 = vmatprep.subr.bf16.mxu0 %v808_v0  ;;  %v810_v2 = vld [vmem:[%s1291_s0] sm:$0xff]   ;;  %v811_v3 = vld [vmem:[%s1291_s0 + $0x8] sm:$0xff]   ;;  %v816_v7 = vld [vmem:[%s1292_s3 + $0x10] sm:$0xff]  }
   0x3   :  { %765 = vmatpush3.bf16.msra.mxu0 %v808_v0  ;;  %768 = vmatprep.mubr.msk.bf16.mxu0 %vm77_vm0, %v810_v2  ;;  %v814_v5 = vld [vmem:[%s1292_s3] sm:$0xff]   ;;  %v815_v6 = vld [vmem:[%s1292_s3 + $0x8] sm:$0xff]   ;;  %v813_v8 = vld [vmem:[%s1291_s0 + $0x18] sm:$0xff]  }
   0x4   :  { %766 = vmatprep.subr.bf16.mxu0 %v809_v1  ;;  %776 = vmatprep.subr.bf16.mxu1 %v814_v5  ;;  %v817_v9 = vld [vmem:[%s1292_s3 + $0x18] sm:$0xff]   ;;  %v818_v10 = vld [vmem:[%s1292_s3 + $0x20] sm:$0xff]   ;;  %v819_v11 = vld [vmem:[%s1292_s3 + $0x28] sm:$0xff]  }
   0x5   :  { %777 = vmatpush3.bf16.msra.mxu1 %v814_v5  ;;  %v820_v12 = vld [vmem:[%s1292_s3 + $0x30] sm:$0xff]   ;;  %v821_v13 = vld [vmem:[%s1292_s3 + $0x38] sm:$0xff]   ;;  %v710_v14 = vld [vmem:[%s1293_s2] ss:$0 sm:$0xff] }
   0x6   :  { %778 = vmatprep.subr.bf16.mxu1 %v815_v6  ;;  %v721_v44 = vld [vmem:[%s1294_s4] ss:$0 sm:$0xff]  ;;  %v981_v62 = vld [vmem:[%s1295_s5 + $0x8] sm:$0xff]  ;;  %v987_v63 = vld [vmem:[%s1295_s5 + $0x10] sm:$0xff] }
   0x7   :  { %767 = vmatpush3.bf16.msra.mxu0 %v809_v1  ;;  %v975_v61 = vld [vmem:[%s1295_s5] sm:$0xff]  ;;  %v993_v0 = vld [vmem:[%s1295_s5 + $0x18] sm:$0xff]  ;;  %v335_v1 = vlaneseq }
   0x9   :  { %779 = vmatpush3.bf16.msra.mxu1 %v815_v6  ;;  %v996_v2 = vand.u32 127, %v335_v1 }
   0xa   :  { %769 = vmatmul.mubr.msk.bf16.vlgmr.msra.gmra.mrb[0].mxu0 %vm77_vm0, %v811_v3  ;;  %780 = vmatprep.subr.bf16.mxu1 %v816_v7 }
   0xb   :  { %772 = vmatprep.mubr.msk.bf16.mxu0 %vm77_vm0, %v812_v4 }
   0xd   :  { %781 = vmatpush3.bf16.msra.mxu1 %v816_v7 }
   0xe   :  { %782 = vmatprep.subr.bf16.mxu1 %v817_v9 }
  0x11   :  { %783 = vmatpush3.bf16.msra.mxu1 %v817_v9 }
  0x12   :  { %773 = vmatmul.mubr.msk.bf16.gmra.mrb[4].mxu0 %vm77_vm0, %v813_v8  ;;  %784 = vmatprep.subr.bf16.mxu1 %v818_v10 }
  0x15   :  { %785 = vmatpush3.bf16.msra.mxu1 %v818_v10 }
  0x16   :  { %786 = vmatprep.subr.bf16.mxu1 %v819_v11 }
  0x19   :  { %787 = vmatpush3.bf16.msra.mxu1 %v819_v11 }
  0x1a   :  { %788 = vmatprep.subr.bf16.mxu1 %v820_v12 }
  0x1d   :  { %789 = vmatpush3.bf16.msra.mxu1 %v820_v12 }
  0x1e   :  { %790 = vmatprep.subr.bf16.mxu1 %v821_v13 }
  0x21   :  { %791 = vmatpush3.bf16.msra.mxu1 %v821_v13 }
  0xdd   :  { %v770_v15 = vpop.f32.mrb[0].mxu0 }
  0xde   :  { %v133_v16 = vadd.f32 %v770_v15, %v710_v14  ;;  %v124_v17 = vpop.f32.mrb[1].mxu0 }
  0xdf   :  { %v125_v18 = vadd.f32 %v710_v14, %v124_v17  ;;  %v771_v19 = vpop.f32.mrb[2].mxu0 }
  0xe0   :  { %v136_v20 = vadd.f32 %v771_v19, %v710_v14  ;;  %v127_v21 = vpop.f32.mrb[3].mxu0  ;;  %v157_v23 = vmax.f32 %v133_v16, 0.0 }
  0xe1   :  { %v128_v22 = vadd.f32 %v710_v14, %v127_v21  ;;  %v155_v25 = vmax.f32 %v125_v18, 0.0 }
  0xe2   :  { %v158_v24 = vmax.f32 %v136_v20, 0.0 }
  0xe3   :  { %v156_v26 = vmax.f32 %v128_v22, 0.0 }
  0xe4   :  { %v164_v27 = vpack.c.bf16 %v158_v24, %v157_v23 }
  0xe5   :  { %v774_v28 = vpop.f32.mrb[4].mxu0  ;;  %v163_v29 = vpack.c.bf16 %v156_v26, %v155_v25 }
  0xe6   :  { %v149_v30 = vadd.f32 %v774_v28, %v710_v14  ;;  %v140_v31 = vpop.f32.mrb[5].mxu0 }
  0xe7   :  { %v141_v32 = vadd.f32 %v710_v14, %v140_v31  ;;  %v775_v33 = vpop.f32.mrb[6].mxu0  ;;  %792 = vmatprep.mubr.bf16.mxu1 %v163_v29 }
  0xe8   :  { %v161_v34 = vmax.f32 %v149_v30, 0.0  ;;  %v152_v35 = vadd.f32 %v775_v33, %v710_v14  ;;  %v143_v36 = vpop.f32.mrb[7].mxu0  ;;  %793 = vmatmul.mubr.bf16.vlgmr.msra.gmra.mrb[0].mxu1 %v164_v27 }
  0xe9   :  { %v159_v37 = vmax.f32 %v141_v32, 0.0  ;;  %v144_v38 = vadd.f32 %v710_v14, %v143_v36  ;;  %v1095_v36 = vld [vmem:[%s1295_s5 + $0x28] sm:$0xff] }
  0xea   :  { %v162_v39 = vmax.f32 %v152_v35, 0.0  ;;  %v1089_v35 = vld [vmem:[%s1295_s5 + $0x20] sm:$0xff] }
  0xeb   :  { %v160_v40 = vmax.f32 %v144_v38, 0.0  ;;  %v1107_v38 = vld [vmem:[%s1295_s5 + $0x38] sm:$0xff] }
  0xec   :  { %v166_v41 = vpack.c.bf16 %v162_v39, %v161_v34 }
  0xed   :  { %v165_v42 = vpack.c.bf16 %v160_v40, %v159_v37  ;;  %v1101_v37 = vld [vmem:[%s1295_s5 + $0x30] sm:$0xff] }
  0xef   :  { %796 = vmatprep.mubr.bf16.mxu1 %v165_v42 }
  0xf0   :  { %797 = vmatmul.mubr.bf16.gmra.mrb[4].mxu1 %v166_v41 }
 0x1bb   :  { %v794_v45 = vpop.f32.mrb[0].mxu1 }
 0x1bc   :  { %v948_v46 = vadd.f32 %v794_v45, %v721_v44  ;;  %v272_v47 = vpop.f32.mrb[1].mxu1 }
 0x1bd   :  { %v950_v48 = vadd.f32 %v721_v44, %v272_v47  ;;  %v795_v49 = vpop.f32.mrb[2].mxu1 }
 0x1be   :  { %341 = vmax.xlane.f32.xlu1 %v948_v46  ;;  %v275_v50 = vpop.f32.mrb[3].mxu1  ;;  %v954_v51 = vadd.f32 %v795_v49, %v721_v44 }
 0x1bf   :  { %337 = vmax.xlane.f32.xlu0 %v950_v48  ;;  %v956_v52 = vadd.f32 %v721_v44, %v275_v50 }
 0x1c2   :  { %343 = vmax.xlane.f32.xlu1 %v954_v51 }
 0x1c3   :  { %v798_v53 = vpop.f32.mrb[4].mxu1  ;;  %339 = vmax.xlane.f32.xlu0 %v956_v52 }
 0x1c4   :  { %v960_v54 = vadd.f32 %v798_v53, %v721_v44  ;;  %v288_v55 = vpop.f32.mrb[5].mxu1 }
 0x1c5   :  { %v799_v56 = vpop.f32.mrb[6].mxu1  ;;  %v966_v59 = vadd.f32 %v721_v44, %v288_v55 }
 0x1c6   :  { %v962_v57 = vadd.f32 %v799_v56, %v721_v44  ;;  %v291_v58 = vpop.f32.mrb[7].mxu1 }
 0x1c7   :  { %349 = vmax.xlane.f32.xlu0 %v960_v54  ;;  %v968_v60 = vadd.f32 %v721_v44, %v291_v58 }
 0x1c8   :  { %351 = vmax.xlane.f32.xlu1 %v962_v57 }
 0x1cb   :  { %345 = vmax.xlane.f32.xlu0 %v966_v59 }
 0x1cc   :  { %347 = vmax.xlane.f32.xlu1 %v968_v60 }
 0x1dd   :  { %418 = vperm.xlu1 %806, %v975_v61  }
 0x1e1   :  { %421 = vperm.xlu0 %807, %v981_v62  }
 0x1e5   :  { %424 = vperm.xlu0 %807, %v987_v63  }
 0x1e9   :  { %427 = vperm.xlu0 %807, %v993_v0  }
 0x24b   :  { %v998_v3 = vpop.xlane.xlu1 %341 }
 0x24c   :  { %vm491_vm1 = vcmp.eq.f32.partialorder %v948_v46, %v998_v3  ;;  %v1002_v4 = vpop.xlane.xlu0 %337  ;;  %v355_v41 = vsub.f32 %v948_v46, %v998_v3 }
 0x24d   :  { %vm489_vm2 = vcmp.eq.f32.partialorder %v950_v48, %v1002_v4  ;;  %v1007_v5 = vsel %vm491_vm1, %v996_v2, 128  ;;  %v353_v39 = vsub.f32 %v950_v48, %v1002_v4 }
 0x24e   :  { %v534_v6 = vshra.s32 %v1007_v5, 16  ;;  %v1011_v7 = vsel %vm489_vm2, %v996_v2, 128  ;;  %v365_v47 = vmul.f32 1.442695, %v355_v41 }
 0x24f   :  { %v1013_v8 = vpop.xlane.xlu1 %343  ;;  %v506_v11 = vshra.s32 %v1011_v7, 16  ;;  %v361_v42 = vmul.f32 1.442695, %v353_v39 }
 0x250   :  { %vm492_vm3 = vcmp.eq.f32.partialorder %v954_v51, %v1013_v8  ;;  %v1017_v9 = vpop.xlane.xlu0 %339  ;;  %v1019_v10 = vcvt.s32.f32 %v534_v6  ;;  %v356_v55 = vsub.f32 %v954_v51, %v1013_v8 }
 0x251   :  { %vm490_vm4 = vcmp.eq.f32.partialorder %v956_v52, %v1017_v9  ;;  %v1025_v12 = vsel %vm492_vm3, %v996_v2, 128  ;;  %v1036_v17 = vcvt.s32.f32 %v506_v11  ;;  %v354_v40 = vsub.f32 %v956_v52, %v1017_v9 }
 0x252   :  { %537 = vmin.xlane.f32.xlu0 %v1019_v10  ;;  %v548_v13 = vshra.s32 %v1025_v12, 16  ;;  %v1030_v14 = vsel %vm490_vm4, %v996_v2, 128  ;;  %822 = vpow2.f32 %v361_v42  ;;  %v367_v1 = vmul.f32 1.442695, %v356_v55 }
 0x253   :  { %v520_v18 = vshra.s32 %v1030_v14, 16  ;;  %v363_v44 = vmul.f32 1.442695, %v354_v40 }
 0x254   :  { %v1032_v15 = vpop.xlane.xlu0 %349  ;;  %v1034_v16 = vcvt.s32.f32 %v548_v13 }
 0x255   :  { %vm495_vm5 = vcmp.eq.f32.partialorder %v960_v54, %v1032_v15  ;;  %v1041_v19 = vpop.xlane.xlu1 %351  ;;  %v1056_v24 = vcvt.s32.f32 %v520_v18  ;;  %v359_v45 = vsub.f32 %v960_v54, %v1032_v15  ;;  %824 = vpow2.f32 %v363_v44 }
 0x256   :  { %vm496_vm6 = vcmp.eq.f32.partialorder %v962_v57, %v1041_v19  ;;  %551 = vmin.xlane.f32.xlu1 %v1034_v16  ;;  %509 = vmin.xlane.f32.xlu0 %v1036_v17  ;;  %v1048_v20 = vsel %vm495_vm5, %v996_v2, 128  ;;  %826 = vpow2.f32 %v365_v47  ;;  %v360_v6 = vsub.f32 %v962_v57, %v1041_v19 }
 0x257   :  { %v590_v21 = vshra.s32 %v1048_v20, 16  ;;  %v1052_v22 = vsel %vm496_vm6, %v996_v2, 128  ;;  %v373_v49 = vmul.f32 1.442695, %v359_v45  ;;  %v533_v45 = vand.u32 65535, %v1007_v5 }
 0x258   :  { %v1054_v23 = vpop.xlane.xlu0 %345  ;;  %v604_v25 = vshra.s32 %v1052_v22, 16 }
 0x259   :  { %vm493_vm7 = vcmp.eq.f32.partialorder %v966_v59, %v1054_v23  ;;  %v1061_v26 = vpop.xlane.xlu1 %347  ;;  %v1063_v27 = vcvt.s32.f32 %v590_v21  ;;  %v357_v50 = vsub.f32 %v966_v59, %v1054_v23  ;;  %828 = vpow2.f32 %v373_v49 }
 0x25a   :  { %vm494_vm8 = vcmp.eq.f32.partialorder %v968_v60, %v1061_v26  ;;  %523 = vmin.xlane.f32.xlu1 %v1056_v24  ;;  %v1070_v28 = vsel %vm493_vm7, %v996_v2, 128  ;;  %v1075_v30 = vcvt.s32.f32 %v604_v25  ;;  %v375_v21 = vmul.f32 1.442695, %v360_v6 }
 0x25b   :  { %593 = vmin.xlane.f32.xlu0 %v1063_v27  ;;  %v1073_v29 = vsel %vm494_vm8, %v996_v2, 128  ;;  %v562_v31 = vshra.s32 %v1070_v28, 16  ;;  %v369_v58 = vmul.f32 1.442695, %v357_v50  ;;  %v535_v49 = vcvt.s32.f32 %v533_v45 }
 0x25c   :  { %v576_v32 = vshra.s32 %v1073_v29, 16  ;;  %v823_v13 = vpop.eup %822  ;;  %v505_v50 = vand.u32 65535, %v1011_v7 }
 0x25d   :  { %v1080_v33 = vcvt.s32.f32 %v562_v31  ;;  %830 = vpow2.f32 %v369_v58  ;;  %v419_v25 = vpop.permute.xlu1 %418  ;;  %v519_v58 = vand.u32 65535, %v1030_v14 }
 0x25e   :  { %607 = vmin.xlane.f32.xlu1 %v1075_v30  ;;  %v1083_v34 = vcvt.s32.f32 %v576_v32  ;;  %832 = vpow2.f32 %v367_v1  ;;  %vm441_vm11 = vcmp.eq.s32.totalorder %v996_v2, %v419_v25  ;;  %v547_v1 = vand.u32 65535, %v1025_v12 }
 0x25f   :  { %565 = vmin.xlane.f32.xlu0 %v1080_v33  ;;  %v825_v18 = vpop.eup %824  ;;  %834 = vpow2.f32 %v375_v21 }
 0x260   :  { %v422_v43 = vpop.permute.xlu0 %421  ;;  %v827_v31 = vpop.eup %826  ;;  %v549_v6 = vcvt.s32.f32 %v547_v1 }
 0x261   :  { %vm442_vm9 = vcmp.eq.s32.totalorder %v996_v2, %v422_v43 }
 0x262   :  { %579 = vmin.xlane.f32.xlu1 %v1083_v34  ;;  %v450_v56 = vsel %vm442_vm9, %v956_v52, 0.0  ;;  %v358_v52 = vsub.f32 %v968_v60, %v1061_v26  ;;  %vm312_vm9 = vcmp.ge.s32.totalorder %v981_v62, 0 }
 0x263   :  { %v829_v32 = vpop.eup %828 }
 0x264   :  { %v425_v53 = vpop.permute.xlu0 %424  ;;  %v371_v39 = vmul.f32 1.442695, %v358_v52 }
 0x265   :  { %vm443_vm10 = vcmp.eq.s32.totalorder %v996_v2, %v425_v53 }
 0x266   :  { %v451_v11 = vsel %vm443_vm10, %v948_v46, 0.0  ;;  %v449_v46 = vsel %vm441_vm11, %v950_v48, 0.0  ;;  %836 = vpow2.f32 %v371_v39  ;;  %vm313_vm10 = vcmp.ge.s32.totalorder %v987_v63, 0 }
 0x267   :  { %v831_v40 = vpop.eup %830  ;;  %vm311_vm11 = vcmp.ge.s32.totalorder %v975_v61, 0 }
 0x268   :  { %v833_v41 = vpop.eup %832  ;;  %v428_v44 = vpop.permute.xlu0 %427 }
 0x269   :  { %v835_v42 = vpop.eup %834  ;;  %vm444_vm0 = vcmp.eq.s32.totalorder %v996_v2, %v428_v44 }
 0x26a   :  { %v452_v21 = vsel %vm444_vm0, %v954_v51, 0.0  ;;  %v603_v51 = vand.u32 65535, %v1052_v22 }
 0x270   :  { %v837_v43 = vpop.eup %836 }
 0x273   :  { %430 = vperm.xlu1 %806, %v1089_v35  }
 0x275   :  { %433 = vperm.xlu0 %807, %v1095_v36  }
 0x279   :  { %436 = vperm.xlu0 %807, %v1101_v37  }
 0x27d   :  { %439 = vperm.xlu0 %807, %v1107_v38  }
 0x297   :  { %459 = vadd.xlane.f32.xlu1 %v450_v56  ;;  %v507_v56 = vcvt.s32.f32 %v505_v50 }
 0x29b   :  { %461 = vadd.xlane.f32.xlu1 %v451_v11  ;;  %v589_v11 = vand.u32 65535, %v1048_v20 }
 0x29c   :  { %377 = vadd.xlane.f32.xlu0 %v823_v13 }
 0x29f   :  { %379 = vadd.xlane.f32.xlu1 %v825_v18  ;;  %v561_v18 = vand.u32 65535, %v1070_v28 }
 0x2a0   :  { %381 = vadd.xlane.f32.xlu0 %v827_v31 }
 0x2a1   :  { %v563_v25 = vcvt.s32.f32 %v561_v18 }
 0x2a3   :  { %389 = vadd.xlane.f32.xlu1 %v829_v32 }
 0x2a4   :  { %457 = vadd.xlane.f32.xlu0 %v449_v46 }
 0x2a7   :  { %385 = vadd.xlane.f32.xlu1 %v831_v40 }
 0x2a8   :  { %383 = vadd.xlane.f32.xlu0 %v833_v41 }
 0x2ac   :  { %391 = vadd.xlane.f32.xlu0 %v835_v42 }
 0x2b0   :  { %387 = vadd.xlane.f32.xlu0 %v837_v43 }
 0x2df   :  { %v1133_v47 = vpop.xlane.xlu0 %537 }
 0x2e0   :  { %vm539_vm12 = vcmp.eq.f32.partialorder %v1019_v10, %v1133_v47  ;;  %v521_v10 = vcvt.s32.f32 %v519_v58 }
 0x2e1   :  { %v540_v48 = vsel %vm539_vm12, %v535_v49, inf  ;;  %vm314_vm12 = vcmp.ge.s32.totalorder %v993_v0, 0 }
 0x2e2   :  { %541 = vmin.xlane.f32.xlu1 %v540_v48 }
 0x2e3   :  { %v1138_v53 = vpop.xlane.xlu1 %551  ;;  %v1140_v55 = vpop.xlane.xlu0 %509 }
 0x2e4   :  { %vm511_vm13 = vcmp.eq.f32.partialorder %v1036_v17, %v1140_v55  ;;  %vm553_vm14 = vcmp.eq.f32.partialorder %v1034_v16, %v1138_v53  ;;  %v591_v17 = vcvt.s32.f32 %v589_v11  ;;  %v516_v11 = vcvt.f32.s32 %v1140_v55 }
 0x2e5   :  { %v512_v5 = vsel %vm511_vm13, %v507_v56, inf  ;;  %v554_v14 = vsel %vm553_vm14, %v549_v6, inf  ;;  %vm317_vm13 = vcmp.ge.s32.totalorder %v1101_v37, 0  ;;  %vm315_vm14 = vcmp.ge.s32.totalorder %v1089_v35, 0 }
 0x2e6   :  { %513 = vmin.xlane.f32.xlu0 %v512_v5 }
 0x2e7   :  { %v1148_v7 = vpop.xlane.xlu1 %523 }
 0x2e8   :  { %v1151_v13 = vpop.xlane.xlu0 %593  ;;  %vm525_vm15 = vcmp.eq.f32.partialorder %v1056_v24, %v1148_v7 }
 0x2e9   :  { %v526_v12 = vsel %vm525_vm15, %v521_v10, inf  ;;  %vm595_vm1 = vcmp.eq.f32.partialorder %v1063_v27, %v1151_v13  ;;  %v575_v27 = vand.u32 65535, %v1073_v29  ;;  %v605_v29 = vcvt.s32.f32 %v603_v51 }
 0x2ea   :  { %527 = vmin.xlane.f32.xlu1 %v526_v12  ;;  %555 = vmin.xlane.f32.xlu0 %v554_v14  ;;  %v596_v52 = vsel %vm595_vm1, %v591_v17, inf  ;;  %v855_v14 = vmov 0.0   ;;  %v600_v55 = vcvt.f32.s32 %v1151_v13  ;;  %vm649_vm15 = vcmask 7168  }
 0x2eb   :  { %v1158_v16 = vpop.xlane.xlu1 %607  ;;  %v577_v32 = vcvt.s32.f32 %v575_v27  ;;  %v1194_v17 = vsel %vm312_vm9, 1.0, %v855_v14  ;;  %v1197_v18 = vsel %vm313_vm10, 1.0, %v855_v14 }
 0x2ec   :  { %v1161_v20 = vpop.xlane.xlu0 %565  ;;  %vm609_vm6 = vcmp.eq.f32.partialorder %v1075_v30, %v1158_v16 }
 0x2ed   :  { %vm567_vm2 = vcmp.eq.f32.partialorder %v1080_v33, %v1161_v20  ;;  %v610_v41 = vsel %vm609_vm6, %v605_v29, inf }
 0x2ee   :  { %463 = vadd.xlane.f32.xlu1 %v452_v21  ;;  %597 = vmin.xlane.f32.xlu0 %v596_v52  ;;  %v568_v31 = vsel %vm567_vm2, %v563_v25, inf  ;;  %v558_v21 = vcvt.f32.s32 %v1138_v53  ;;  %v530_v52 = vcvt.f32.s32 %v1148_v7  ;;  %v572_v53 = vcvt.f32.s32 %v1161_v20 }
 0x2ef   :  { %v1166_v24 = vpop.xlane.xlu1 %579  ;;  %v730_v7 = vsel %vm311_vm11, 1.0, %v855_v14  ;;  %vm316_vm2 = vcmp.ge.s32.totalorder %v1095_v36, 0 }
 0x2f0   :  { %vm581_vm3 = vcmp.eq.f32.partialorder %v1083_v34, %v1166_v24  ;;  %v586_v29 = vcvt.f32.s32 %v1166_v24  ;;  %v573_v24 = vshll.u32 %v572_v53, 16 }
 0x2f1   :  { %v582_v33 = vsel %vm581_vm3, %v577_v32, inf  ;;  %v517_v32 = vshll.u32 %v516_v11, 16 }
 0x2f2   :  { %569 = vmin.xlane.f32.xlu0 %v568_v31 }
 0x2f3   :  { %v431_v28 = vpop.permute.xlu1 %430 }
 0x2f4   :  { %vm445_vm4 = vcmp.eq.s32.totalorder %v996_v2, %v431_v28  ;;  %v434_v39 = vpop.permute.xlu0 %433 }
 0x2f5   :  { %v453_v46 = vsel %vm445_vm4, %v966_v59, 0.0  ;;  %vm446_vm5 = vcmp.eq.s32.totalorder %v996_v2, %v434_v39 }
 0x2f6   :  { %465 = vadd.xlane.f32.xlu1 %v453_v46  ;;  %583 = vmin.xlane.f32.xlu0 %v582_v33  ;;  %v454_v34 = vsel %vm446_vm5, %v968_v60, 0.0  ;;  %v614_v46 = vcvt.f32.s32 %v1158_v16  ;;  %v559_v33 = vshll.u32 %v558_v21, 16  ;;  %vm318_vm5 = vcmp.ge.s32.totalorder %v1107_v38, 0 }
 0x2f8   :  { %v437_v40 = vpop.permute.xlu0 %436 }
 0x2f9   :  { %vm447_vm7 = vcmp.eq.s32.totalorder %v996_v2, %v437_v40 }
 0x2fa   :  { %467 = vadd.xlane.f32.xlu1 %v454_v34  ;;  %611 = vmin.xlane.f32.xlu0 %v610_v41  ;;  %v455_v59 = vsel %vm447_vm7, %v960_v54, 0.0  ;;  %v601_v34 = vshll.u32 %v600_v55, 16 }
 0x2fc   :  { %v440_v22 = vpop.permute.xlu0 %439 }
 0x2fd   :  { %vm448_vm8 = vcmp.eq.s32.totalorder %v996_v2, %v440_v22 }
 0x2fe   :  { %469 = vadd.xlane.f32.xlu1 %v455_v59  ;;  %v456_v42 = vsel %vm448_vm8, %v962_v57, 0.0  ;;  %v544_v57 = vcvt.f32.s32 %v1133_v47 }
 0x2ff   :  { %471 = vadd.xlane.f32.xlu0 %v456_v42 }
 0x300   :  { %v545_v47 = vshll.u32 %v544_v57, 16 }
 0x324   :  { %v1182_v30 = vpop.xlane.xlu1 %459 }
 0x328   :  { %v1184_v45 = vpop.xlane.xlu1 %461 }
 0x329   :  { %v378_v43 = vpop.xlane.xlu0 %377 }
 0x32c   :  { %v380_v49 = vpop.xlane.xlu1 %379 }
 0x32d   :  { %v382_v44 = vpop.xlane.xlu0 %381  ;;  %838 = vlog2.f32 %v380_v49 }
 0x32e   :  { %840 = vlog2.f32 %v378_v43 }
 0x32f   :  { %842 = vlog2.f32 %v382_v44  ;;  %v1217_v44 = vshll.u32 %v614_v46, 16 }
 0x330   :  { %v390_v48 = vpop.xlane.xlu1 %389 }
 0x331   :  { %v1186_v60 = vpop.xlane.xlu0 %457 }
 0x334   :  { %v386_v2 = vpop.xlane.xlu1 %385 }
 0x335   :  { %v384_v50 = vpop.xlane.xlu0 %383 }
 0x336   :  { %844 = vlog2.f32 %v384_v50 }
 0x337   :  { %v839_v56 = vpop.eup %838  ;;  %846 = vlog2.f32 %v386_v2 }
 0x338   :  { %v841_v58 = vpop.eup %840  ;;  %v396_v1 = vmul.f32 0.6931472, %v839_v56  ;;  %848 = vlog2.f32 %v390_v48 }
 0x339   :  { %v392_v54 = vpop.xlane.xlu0 %391  ;;  %v843_v6 = vpop.eup %842  ;;  %v394_v25 = vmul.f32 0.6931472, %v841_v58 }
 0x33a   :  { %v410_v27 = vadd.f32 %v396_v1, %v1017_v9  ;;  %v398_v31 = vmul.f32 0.6931472, %v843_v6  ;;  %v531_v9 = vshll.u32 %v530_v52, 16 }
 0x33b   :  { %v409_v16 = vadd.f32 %v394_v25, %v1002_v4 }
 0x33c   :  { %v474_v41 = vsub.f32 %v410_v27, %v1182_v30  ;;  %v411_v22 = vadd.f32 %v398_v31, %v998_v3  ;;  %v587_v30 = vshll.u32 %v586_v29, 16 }
 0x33d   :  { %v388_v5 = vpop.xlane.xlu0 %387  ;;  %v473_v56 = vsub.f32 %v409_v16, %v1186_v60 }
 0x33e   :  { %850 = vlog2.f32 %v388_v5  ;;  %v475_v2 = vsub.f32 %v411_v22, %v1184_v45  ;;  %v482_v58 = vmul.f32 %v1194_v17, %v474_v41 }
 0x33f   :  { %852 = vlog2.f32 %v392_v54  ;;  %v481_v21 = vmul.f32 %v730_v7, %v473_v56 }
 0x340   :  { %v845_v13 = vpop.eup %844 }
 0x341   :  { %v400_v49 = vmul.f32 0.6931472, %v845_v13  ;;  %v847_v4 = vpop.eup %846 }
 0x342   :  { %v849_v6 = vpop.eup %848  ;;  %v402_v11 = vmul.f32 0.6931472, %v847_v4  ;;  %v735_v4 = vsel %vm316_vm2, 1.0, %v855_v14 }
 0x343   :  { %v412_v60 = vadd.f32 %v400_v49, %v1013_v8  ;;  %v734_v8 = vsel %vm315_vm14, 1.0, %v855_v14 }
 0x36f   :  { %v542_v10 = vpop.xlane.xlu1 %541 }
 0x370   :  { %v543_v12 = vcvt.f32.s32 %v542_v10 }
 0x372   :  { %v546_v51 = vadd.s32 %v545_v47, %v543_v12 }
 0x373   :  { %v514_v28 = vpop.xlane.xlu0 %513 }
 0x374   :  { %v515_v39 = vcvt.f32.s32 %v514_v28  ;;  %vm619_vm0 = vcmp.eq.s32.totalorder %v546_v51, %v987_v63  ;;  %v406_v51 = vmul.f32 0.6931472, %v849_v6 }
 0x375   :  { %v740_v63 = vsel %vm619_vm0, 1.0, %v855_v14 }
 0x376   :  { %v518_v40 = vadd.s32 %v517_v32, %v515_v39  ;;  %v643_v12 = vmul.f32 %v740_v63, %v1197_v18  ;;  %v483_v32 = vmul.f32 %v1197_v18, %v475_v2  ;;  %v651_v39 = vsel %vm649_vm15, %v482_v58, 0.0 }
 0x377   :  { %v528_v20 = vpop.xlane.xlu1 %527  ;;  %v556_v59 = vpop.xlane.xlu0 %555  ;;  %v415_v56 = vadd.f32 %v406_v51, %v1032_v15 }
 0x378   :  { %vm617_vm1 = vcmp.eq.s32.totalorder %v518_v40, %v975_v61  ;;  %v529_v42 = vcvt.f32.s32 %v528_v20  ;;  %v557_v43 = vcvt.f32.s32 %v556_v59  ;;  %v733_v61 = vsel %vm314_vm12, 1.0, %v855_v14 }
 0x379   :  { %v738_v50 = vsel %vm617_vm1, 1.0, %v855_v14 }
 0x37a   :  { %v532_v3 = vadd.s32 %v531_v9, %v529_v42  ;;  %v560_v48 = vadd.s32 %v559_v33, %v557_v43  ;;  %v641_v1 = vmul.f32 %v738_v50, %v730_v7  ;;  %v679_v7 = vsel %vm649_vm15, %v643_v12, 0.0 }
 0x37b   :  { %v598_v57 = vpop.xlane.xlu0 %597  ;;  %v464_v54 = vpop.xlane.xlu1 %463  ;;  %v413_v33 = vadd.f32 %v402_v11, %v1054_v23  ;;  %v650_v9 = vsel %vm649_vm15, %v481_v21, 0.0  ;;  %v653_v42 = vsel %vm649_vm15, %v483_v32, 0.0 }
 0x37c   :  { %vm618_vm3 = vcmp.eq.s32.totalorder %v532_v3, %v981_v62  ;;  %vm620_vm4 = vcmp.eq.s32.totalorder %v560_v48, %v993_v0  ;;  %v599_v10 = vcvt.f32.s32 %v598_v57  ;;  %v1238_v62 = vsel %vm317_vm13, 1.0, %v855_v14  ;;  %v851_v0 = vpop.eup %850 }
 0x37d   :  { %v739_v45 = vsel %vm618_vm3, 1.0, %v855_v14  ;;  %v741_v5 = vsel %vm620_vm4, 1.0, %v855_v14  ;;  %v476_v52 = vsub.f32 %v412_v60, %v464_v54  ;;  %v676_v27 = vsel %vm649_vm15, %v641_v1, 0.0  ;;  %v853_v16 = vpop.eup %852 }
 0x37e   :  { %v642_v47 = vmul.f32 %v739_v45, %v1194_v17  ;;  %v644_v55 = vmul.f32 %v741_v5, %v733_v61  ;;  %v602_v31 = vadd.s32 %v601_v34, %v599_v10  ;;  %v404_v53 = vmul.f32 0.6931472, %v851_v0 }
 0x37f   :  { %v570_v25 = vpop.xlane.xlu0 %569  ;;  %v484_v29 = vmul.f32 %v733_v61, %v476_v52  ;;  %v652_v59 = vadd.f32 %v651_v39, %v650_v9  ;;  %v408_v48 = vmul.f32 0.6931472, %v853_v16 }
 0x380   :  { %v677_v17 = vsel %vm649_vm15, %v642_v47, 0.0  ;;  %v571_v28 = vcvt.f32.s32 %v570_v25  ;;  %v681_v41 = vsel %vm649_vm15, %v644_v55, 0.0  ;;  %vm623_vm6 = vcmp.eq.s32.totalorder %v602_v31, %v1101_v37 }
 0x381   :  { %v678_v46 = vadd.f32 %v677_v17, %v676_v27  ;;  %v414_v3 = vadd.f32 %v404_v53, %v1061_v26  ;;  %v744_v63 = vsel %vm623_vm6, 1.0, %v855_v14  ;;  %v655_v61 = vsel %vm649_vm15, %v484_v29, 0.0 }
 0x382   :  { %v574_v13 = vadd.s32 %v573_v24, %v571_v28  ;;  %v647_v5 = vmul.f32 %v744_v63, %v1238_v62  ;;  %v416_v47 = vadd.f32 %v408_v48, %v1041_v19 }
 0x383   :  { %v680_v40 = vadd.f32 %v679_v7, %v678_v46  ;;  %v466_v34 = vpop.xlane.xlu1 %465  ;;  %v584_v22 = vpop.xlane.xlu0 %583 }
 0x384   :  { %vm621_vm7 = vcmp.eq.s32.totalorder %v574_v13, %v1089_v35  ;;  %v477_v18 = vsub.f32 %v413_v33, %v466_v34  ;;  %v585_v20 = vcvt.f32.s32 %v584_v22  ;;  %v687_v27 = vsel %vm649_vm15, %v647_v5, 0.0 }
 0x385   :  { %v682_v43 = vadd.f32 %v681_v41, %v680_v40  ;;  %v742_v23 = vsel %vm621_vm7, 1.0, %v855_v14 }
 0x386   :  { %v485_v24 = vmul.f32 %v734_v8, %v477_v18  ;;  %v645_v49 = vmul.f32 %v742_v23, %v734_v8  ;;  %v588_v50 = vadd.s32 %v587_v30, %v585_v20  ;;  %v654_v30 = vadd.f32 %v653_v42, %v652_v59 }
 0x387   :  { %v468_v2 = vpop.xlane.xlu1 %467  ;;  %v612_v35 = vpop.xlane.xlu0 %611 }
 0x388   :  { %v683_v57 = vsel %vm649_vm15, %v645_v49, 0.0  ;;  %vm622_vm8 = vcmp.eq.s32.totalorder %v588_v50, %v1095_v36  ;;  %v478_v26 = vsub.f32 %v414_v3, %v468_v2  ;;  %v613_v1 = vcvt.f32.s32 %v612_v35 }
 0x389   :  { %v743_v58 = vsel %vm622_vm8, 1.0, %v855_v14  ;;  %v684_v54 = vadd.f32 %v683_v57, %v682_v43  ;;  %v657_v45 = vsel %vm649_vm15, %v485_v24, 0.0  ;;  %v656_v37 = vadd.f32 %v655_v61, %v654_v30 }
 0x38a   :  { %v486_v60 = vmul.f32 %v735_v4, %v478_v26  ;;  %v646_v15 = vmul.f32 %v743_v58, %v735_v4  ;;  %v616_v10 = vadd.s32 %v1217_v44, %v613_v1  ;;  %v737_v36 = vsel %vm318_vm5, 1.0, %v855_v14 }
 0x38b   :  { %v470_v6 = vpop.xlane.xlu1 %469  ;;  %v658_v21 = vadd.f32 %v657_v45, %v656_v37 }
 0x38c   :  { %v659_v11 = vsel %vm649_vm15, %v486_v60, 0.0  ;;  %v479_v12 = vsub.f32 %v415_v56, %v470_v6  ;;  %v685_v0 = vsel %vm649_vm15, %v646_v15, 0.0  ;;  %vm624_vm9 = vcmp.eq.s32.totalorder %v616_v10, %v1107_v38  ;;  %v472_v52 = vpop.xlane.xlu0 %471 }
 0x38d   :  { %v686_v55 = vadd.f32 %v685_v0, %v684_v54  ;;  %v480_v44 = vsub.f32 %v416_v47, %v472_v52  ;;  %v745_v8 = vsel %vm624_vm9, 1.0, %v855_v14  ;;  %v660_v28 = vadd.f32 %v659_v11, %v658_v21 }
 0x38e   :  { %v487_v25 = vmul.f32 %v1238_v62, %v479_v12  ;;  %v648_v17 = vmul.f32 %v745_v8, %v737_v36 }
 0x38f   :  { %v688_v31 = vadd.f32 %v687_v27, %v686_v55  ;;  %v488_v32 = vmul.f32 %v737_v36, %v480_v44 }
 0x390   :  { %v661_v19 = vsel %vm649_vm15, %v487_v25, 0.0  ;;  %v689_v51 = vsel %vm649_vm15, %v648_v17, 0.0 }
 0x391   :  { %v662_v39 = vadd.f32 %v661_v19, %v660_v28  ;;  %v690_v46 = vadd.f32 %v689_v51, %v688_v31  ;;  %v663_v38 = vsel %vm649_vm15, %v488_v32, 0.0 }
 0x393   :  { %v664_v53 = vadd.f32 %v663_v38, %v662_v39  ;;  %691 = vadd.xlane.f32.xlu0 %v690_v46 }
 0x395   :  { %665 = vadd.xlane.f32.xlu1 %v664_v53 }
 0x420   :  { %v692_v62 = vpop.xlane.xlu0 %691 }
 0x421   :  { %v693_v7 = vrot.slane %v692_v62, 4 }
 0x422   :  { %v666_v14 = vpop.xlane.xlu1 %665 }
 0x423   :  { %v667_v13 = vrot.slane %v666_v14, 4  ;;  %v694_v33 = vadd.f32 %v693_v7, %v692_v62 }
 0x425   :  { %v668_v9 = vadd.f32 %v667_v13, %v666_v14  ;;  %v695_v29 = vrot.slane %v694_v33, 2 }
 0x427   :  { %v669_v40 = vrot.slane %v668_v9, 2  ;;  %v696_v41 = vadd.f32 %v695_v29, %v694_v33 }
 0x429   :  { %v670_v34 = vadd.f32 %v669_v40, %v668_v9  ;;  %v697_v22 = vrot.slane %v696_v41, 1 }
 0x42b   :  { %v671_v16 = vrot.slane %v670_v34, 1  ;;  %v698_v20 = vadd.f32 %v697_v22, %v696_v41 }
 0x42d   :  { %v672_v18 = vadd.f32 %v671_v16, %v670_v34 }
 0x42f   :  { %800 = vpush %v672_v18 }
 0x430   :  { %802 = vpush %v698_v20 }
 0x460   :  { %s801_s5 = spop %800 }
 0x461   :  { %v674_v59 = vstv %s801_s5  ;;  %s803_s20 = spop %802 }
 0x462   :  { %675 = vst [vmem:[%s1296_s6] sm:$0xff] %v674_v59  ;;  %v700_v42 = vstv %s803_s20 }
 0x463   :  { %701 = vst [vmem:[%s1297_s7] sm:$0xff] %v700_v42 }

</bundles_post_ra>
